<compile_context>
chip_gen: v6e
topology: v6e:2x2x1
jax: 0.10.0
libtpu: 0.0.40
codegen_flags: <defaults>
</compile_context>

<pallas_src>
import jax
import jax.numpy as jnp
from jax.experimental import pallas as pl
from jax.experimental.pallas import tpu as pltpu


def _classifier_kernel(x_ref, w_ref, b_ref, o_ref):
    # x: (TB, Dp) VMEM, w: (1, Dp) VMEM (resident), b: (1,) SMEM scalar
    # o: (TB, 1)
    x = x_ref[...].astype(jnp.float32)          # VPU path, f32 math (v5e-safe)
    w = w_ref[...].astype(jnp.float32)          # (1, Dp) broadcasts over rows
    logits = jnp.sum(x * w, axis=-1, keepdims=True)   # lane reduce -> XLU slot
    logits = logits + b_ref[0]                  # scalar bias from SMEM
    o_ref[...] = jax.nn.sigmoid(logits).astype(o_ref.dtype)


def classifier_forward(x, w, b, *, max_tile_b=1024):
    """x: (B, D) f32 embeddings, w: (1, D) f32 (PyTorch nn.Linear layout),
    b: (1,) f32  ->  (B, 1) f32 sigmoid(x @ w.T + b)."""
    B, D = x.shape
    w = jnp.asarray(w, jnp.float32).reshape(1, D)
    b = jnp.asarray(b, jnp.float32).reshape(1)

    # Pad feature dim to a lane-aligned multiple of 128 (zero pad => no-op for dot).
    D_pad = pl.cdiv(D, 128) * 128
    # Batch tile: large to amortize per-grid-step overhead, multiple of 8 sublanes.
    TB = min(max_tile_b, pl.cdiv(B, 8) * 8)
    n_blk = pl.cdiv(B, TB)
    B_pad = n_blk * TB

    x_p = x if (B_pad == B and D_pad == D) else jnp.pad(
        x, ((0, B_pad - B), (0, D_pad - D)))
    w_p = w if D_pad == D else jnp.pad(w, ((0, 0), (0, D_pad - D)))

    out = pl.pallas_call(
        _classifier_kernel,
        out_shape=jax.ShapeDtypeStruct((B_pad, 1), jnp.float32),
        grid_spec=pltpu.PrefetchScalarGridSpec(
            num_scalar_prefetch=0,
            grid=(n_blk,),
            in_specs=[
                # x streamed over the batch axis (double-buffered by Pallas).
                pl.BlockSpec((TB, D_pad), lambda i: (i, 0)),
                # w stays VMEM-resident across all grid steps.
                pl.BlockSpec((1, D_pad), lambda i: (0, 0)),
                # bias as a scalar in SMEM (no VMEM tile / extra DMA stream).
                pl.BlockSpec(memory_space=pltpu.MemorySpace.SMEM),
            ],
            out_specs=pl.BlockSpec((TB, 1), lambda i: (i, 0)),
        ),
        compiler_params=pltpu.CompilerParams(
            # No cross-step carry -> parallel (megacore sharding on v7x).
            dimension_semantics=("parallel",),
        ),
    )(x_p, w_p, b)
    return out[:B]


if __name__ == "__main__":
    input_dim = 42
    batch = 8

    key = jax.random.PRNGKey(0)
    kx, kw, kb = jax.random.split(key, 3)

    # Deterministic parameter init (mimics nn.Linear uniform(-1/sqrt(D), 1/sqrt(D)))
    bound = 1.0 / (input_dim ** 0.5)
    w = jax.random.uniform(kw, (1, input_dim), jnp.float32, -bound, bound)  # (out=1, in=D)
    b = jax.random.uniform(kb, (1,), jnp.float32, -bound, bound)

    x = jax.random.normal(kx, (batch, input_dim), jnp.float32)

    out = jax.block_until_ready(classifier_forward(x, w, b))

    # Reference check in plain JAX
    ref = jax.nn.sigmoid(x @ w.T + b[None, :])
    assert out.shape == (batch, 1)
    assert jnp.allclose(out, ref, atol=1e-5, rtol=1e-5)

    print("KERNEL_OK")
</pallas_src>

<mosaic_0001>
module attributes {stable_mosaic.version = 11 : i64} {
  func.func @_classifier_kernel(%arg0: i32, %arg1: memref<8x128xf32, #tpu.memory_space<vmem>>, %arg2: memref<1x128xf32, #tpu.memory_space<vmem>>, %arg3: memref<1xf32, #tpu.memory_space<smem>>, %arg4: memref<8x1xf32, #tpu.memory_space<vmem>>) attributes {dimension_semantics = [#tpu.dimension_semantics<parallel>], iteration_bounds = array<i64: 1>, scalar_prefetch = 0 : i64, scratch_operands = 0 : i64, tpu.core_type = #tpu.core_type<tc>, window_params = [{transform_indices = @transform_0, window_bounds = array<i64: 8, 128>}, {pipeline_mode = #tpu.pipeline_mode<synchronous>, transform_indices = @transform_1, window_bounds = array<i64: 1, 128>}, {transform_indices = @transform_2, window_bounds = array<i64: 1>}, {transform_indices = @transform_3, window_bounds = array<i64: 8, 1>}]} {
    %c0 = arith.constant 0 : index
    %c0_0 = arith.constant 0 : index
    %0 = vector.load %arg1[%c0, %c0_0] : memref<8x128xf32, #tpu.memory_space<vmem>>, vector<8x128xf32>
    %c0_1 = arith.constant 0 : index
    %c0_2 = arith.constant 0 : index
    %1 = vector.load %arg2[%c0_1, %c0_2] : memref<1x128xf32, #tpu.memory_space<vmem>>, vector<1x128xf32>
    %2 = vector.broadcast %1 : vector<1x128xf32> to vector<8x128xf32>
    %3 = arith.mulf %0, %2 : vector<8x128xf32>
    %cst = arith.constant dense<0.000000e+00> : vector<8xf32>
    %4 = vector.multi_reduction <add>, %3, %cst [1] : vector<8x128xf32> to vector<8xf32>
    %5 = vector.shape_cast %4 : vector<8xf32> to vector<8x1xf32>
    %c0_3 = arith.constant 0 : index
    %6 = memref.load %arg3[%c0_3] : memref<1xf32, #tpu.memory_space<smem>>
    %7 = vector.broadcast %6 : f32 to vector<8x1xf32>
    %8 = arith.addf %5, %7 : vector<8x1xf32>
    %9 = arith.negf %8 : vector<8x1xf32>
    %10 = math.exp %9 : vector<8x1xf32>
    %cst_4 = arith.constant 1.000000e+00 : f32
    %11 = vector.broadcast %cst_4 : f32 to vector<8x1xf32>
    %12 = arith.addf %11, %10 : vector<8x1xf32>
    %13 = arith.divf %11, %12 : vector<8x1xf32>
    %c0_5 = arith.constant 0 : index
    %c0_6 = arith.constant 0 : index
    %14 = vector.load %arg4[%c0_5, %c0_6] : memref<8x1xf32, #tpu.memory_space<vmem>>, vector<8x1xf32>
    tpu.vector_store %arg4[%c0_5, %c0_6], %13 {strides = array<i32>} : memref<8x1xf32, #tpu.memory_space<vmem>>, vector<8x1xf32>,
    return
  }
  func.func @transform_0(%arg0: i32) -> (i32, i32) {
    %c0_i32 = arith.constant 0 : i32
    %c0_i32_0 = arith.constant 0 : i32
    return %arg0, %c0_i32 : i32, i32
  }
  func.func @transform_1(%arg0: i32) -> (i32, i32) {
    %c0_i32 = arith.constant 0 : i32
    %c0_i32_0 = arith.constant 0 : i32
    %c0_i32_1 = arith.constant 0 : i32
    return %c0_i32, %c0_i32_0 : i32, i32
  }
  func.func @transform_2(%arg0: i32) -> i32 {
    %c0_i32 = arith.constant 0 : i32
    %c0_i32_0 = arith.constant 0 : i32
    return %c0_i32 : i32
  }
  func.func @transform_3(%arg0: i32) -> (i32, i32) {
    %c0_i32 = arith.constant 0 : i32
    %c0_i32_0 = arith.constant 0 : i32
    return %arg0, %c0_i32 : i32, i32
  }
}

</mosaic_0001>

<bundles_post_ra>
// kernel: tpu_custom_call.1
= control target key start
LH: loop header
LB: loop body
LE: loop exit
PB: predicated region body
PF: predicated region fallthrough
CT: control target
= control target key end

     0   :  { %9 = vsyncpa [#allocation4], 0  ;;  %s83_s12 = smov [#allocation3]   ;;  %s116_s0 = inlined_call_operand.hbm [shape: f32[8,128], index: 0, kind: input, shape index: {}]   ;;  %s117_s1 = inlined_call_operand.vmem [shape: f32[1,128], index: 1, kind: input, shape index: {}]   ;;  %s118_s2 = inlined_call_operand.<no memory space> [shape: f32[1], index: 2, kind: input, shape index: {}]   ;;  %s119_s3 = inlined_call_operand.vmem [shape: f32[8,1], index: 3, kind: output, shape index: {}]  }
   0x1   :  { %s16_s13 = sshll.u32 %s83_s12, 4  ;;  %s17_s13 = int_to_ptr.vmem [resolvable:$true] %s16_s13 }
   0x2   :  { %s69_s14 = scalar_lea.vmem %s17_s13, 128  ;;  %p74_p1 = scmp.lt.s32.totalorder %s17_s13, %s17_s13 }
   0x3   :  { %p70_p0 = scmp.ne.s32.totalorder %s17_s13, %s69_s14  ;;  %p75_p2 = scmp.lt.s32.totalorder %s69_s14, %s69_s14 }
   0x5   :  { %p76_p3 = por %p75_p2, %p74_p1 }
   0x7   :  { %p77_p4 = pnand %p76_p3, %p70_p0 }
   0x9   :  { %80 = shalt.err (!%p77_p4)
}
   0xa   :  { %19 = dma.hbm_to_vmem [thread:$0]  %s116_s0, 128, %s17_s13, [#allocation4]  }
   0xb   :  { %81 = dma.done.wait [#allocation4], 128  }
   0xc   :  { %82 = vsyncadd [#allocation4], 4294967168  ;;  %v27_v0 = vld [vmem:[#allocation3] sm:$0xff]  ;;  %v39_v3 = vstv %s118_s2  ;;  %vm47_vm0 = vcmask 7168  }
   0xd   :  { %v54_v1 = vld [vmem:[%s117_s1] ss:$0 sm:$0xff] }
   0xe   :  { %v35_v2 = vmul.f32 %v54_v1, %v27_v0 }
  0x10   :  { %36 = vadd.xlane.f32.xlu0 %v35_v2 }
  0x99   :  { %v37_v4 = vpop.xlane.xlu0 %36 }
  0x9a   :  { %v40_v5 = vadd.f32 %v39_v3, %v37_v4 }
  0x9c   :  { %v55_v6 = vmul.f32 -1.442695, %v40_v5 }
  0x9e   :  { %57 = vpow2.f32 %v55_v6 }
  0xab   :  { %v58_v7 = vpop.eup %57 }
  0xac   :  { %v44_v8 = vadd.f32 1.0, %v58_v7 }
  0xae   :  { %59 = vrcp.f32 %v44_v8 }
  0xbb   :  { %v60_v9 = vpop.eup %59 }
  0xbc   :  { %48 = vst.msk [vmem:[%s119_s3] sm:$0xff] %vm47_vm0, %v60_v9 }
  0xbd   :  { %53 = vsyncpa [#allocation4], 1 }

</bundles_post_ra>
